<compile_context>
chip_gen: v5e
topology: v5e:2x2
jax: 0.10.0
libtpu: 0.0.40
codegen_flags: <defaults>
</compile_context>

<pallas_src>
import jax
import jax.numpy as jnp
import numpy as np
from jax.experimental import pallas as pl
from jax.experimental.pallas import tpu as pltpu

# Full-f32 MXU matmuls: keeps codeword ids bit-identical to the f32 reference below.
jax.config.update("jax_default_matmul_precision", "highest")

# ---------------- configuration (small demo shapes) ----------------
SEQ_LEN = 64          # data_shape[0]
FEAT_DIM = 4          # data_shape[1]
HIDDEN_DIM = 32       # hidden_dim / d_model
N_EMBED = 64          # codebook size
BLOCK_NUM = 1         # TCN block_num
WAVE_LENGTH = 8       # patch size along time
KERNEL_SIZE = 3       # TCN kernel_size (kwargs path of TCN.__init__)
DILATIONS = [1, 4]    # Encoder/Decoder default dilations
LN_EPS = 1e-8
BETA = 0.45
BATCH = 2
N_PATCH = SEQ_LEN // WAVE_LENGTH
TCN_DILATIONS = DILATIONS * BLOCK_NUM
N_BLOCKS = len(TCN_DILATIONS)
N_CONV = 2 * N_BLOCKS
DEC_PAD = 128          # lane-dense decoder output width (wrapper slices to FEAT_DIM)

_VMEM = pltpu.MemorySpace.VMEM
_SMEM = pltpu.MemorySpace.SMEM


# ====================== roll direction probe ======================
# The causal shift needs rows to move toward HIGHER indices by `shift`
# (jnp.roll semantics).  Pin the hardware sublane-roll convention once with a
# tiny eager probe so the fused kernel is robust either way.
_ROLL_SIGN = None


def _roll_probe_kernel(x_ref, o_ref):
    o_ref[...] = pltpu.roll(x_ref[...], 1, axis=0)


def _roll_sign():
    global _ROLL_SIGN
    if _ROLL_SIGN is None:
        x = jnp.arange(8 * 128, dtype=jnp.float32).reshape(8, 128)
        y = pl.pallas_call(
            _roll_probe_kernel,
            out_shape=jax.ShapeDtypeStruct((8, 128), jnp.float32))(x)
        _ROLL_SIGN = 1 if bool(y[1, 0] == x[0, 0]) else -1
    return _ROLL_SIGN


# ====================== in-kernel helpers (traced) ======================

def _ln_relu(h, gamma, beta):
    mu = jnp.mean(h, axis=-1, keepdims=True)
    var = jnp.mean((h - mu) ** 2, axis=-1, keepdims=True)
    hn = (h - mu) * jax.lax.rsqrt(var + LN_EPS)
    return jnp.maximum(hn * gamma + beta, 0.0)


def _causal_conv(h, w_stacked, bias, dil, rib):
    """Causal dilated conv over the batch-stacked seq axis of h: [B*L, H].

    w_stacked is [K*H, H] (rows [t*H:(t+1)*H] = tap t; tap K-1 = current step).
    The K shifted copies of h are lane-concatenated so the whole conv is one
    MXU dot ([n, K*H] x [K*H, H]); shifts use the XLU roll (no VMEM staging).
    """
    n = h.shape[0]
    sign = _roll_sign()
    parts = []
    for t in range(KERNEL_SIZE):
        shift = (KERNEL_SIZE - 1 - t) * dil
        if shift == 0:
            parts.append(h)
        else:
            rolled = pltpu.roll(h, (sign * shift) % n, axis=0)
            # zero rows whose source row crossed the causal / batch boundary
            parts.append(jnp.where(rib >= shift, rolled, 0.0))
    lhs = jnp.concatenate(parts, axis=1)                         # [n, K*H]
    return jnp.dot(lhs, w_stacked, preferred_element_type=jnp.float32) + bias


def _tcn(h, which, tw_ref, tb_ref, g_ref, be_ref, a_ref, ow_ref, ob_ref, rib):
    """Residual blocks (enable_res_parameter=1) + TCN output Linear."""
    for blk, dil in enumerate(TCN_DILATIONS):
        c1, c2 = 2 * blk, 2 * blk + 1
        out1 = _ln_relu(
            _causal_conv(h, tw_ref[which, c1], tb_ref[which, c1], dil, rib),
            g_ref[which, c1], be_ref[which, c1])
        out2 = _ln_relu(
            _causal_conv(out1, tw_ref[which, c2], tb_ref[which, c2], 2 * dil, rib),
            g_ref[which, c2], be_ref[which, c2])
        h = a_ref[which, blk] * out2 + h
    return jnp.dot(h, ow_ref[which], preferred_element_type=jnp.float32) + ob_ref[which]


# ====================== fused Pallas kernel ======================

def _fused_kernel(x_ref, iw_ref, ib_ref,
                  tw_ref, tb_ref, g_ref, be_ref, a_ref, ow_ref, ob_ref,
                  qiw_ref, qib_ref, emb_ref, upw_ref, upb_ref, dow_ref, dob_ref,
                  dec_ref, ids_ref, diff_ref, enc_scr):
    n = BATCH * SEQ_LEN
    np_rows = BATCH * N_PATCH
    rib = jax.lax.broadcasted_iota(jnp.int32, (n, HIDDEN_DIM), 0) % SEQ_LEN

    # ---- Encoder: input Linear(feat -> hidden) + TCN ----
    h = jnp.dot(x_ref[...], iw_ref[...],
                preferred_element_type=jnp.float32) + ib_ref[...]
    enc = _tcn(h, 0, tw_ref, tb_ref, g_ref, be_ref, a_ref, ow_ref, ob_ref, rib)

    # ---- quantize_input: Conv2d(1, H, kernel=(wave, H), stride=same) ----
    # Stage enc once, gather rows {w, w+WAVE, ...} with strided sublane loads
    # and lane-concatenate into the flattened patches -> single K=256 matmul.
    enc_scr[...] = enc
    parts = [enc_scr[pl.ds(w, np_rows, stride=WAVE_LENGTH), :]
             for w in range(WAVE_LENGTH)]
    patches = jnp.concatenate(parts, axis=1)                      # [B*NP, WAVE*H]
    xq = jnp.dot(patches, qiw_ref[...],
                 preferred_element_type=jnp.float32) + qib_ref[...]

    # ---- VQ: nearest codeword (first index on ties), straight-through value ----
    e = emb_ref[...]                                              # [H, K]
    x2 = jnp.sum(xq * xq, axis=1, keepdims=True)                  # [N, 1]
    e2 = jnp.sum(e * e, axis=0, keepdims=True)                    # [1, K]
    dist = x2 - 2.0 * jnp.dot(xq, e, preferred_element_type=jnp.float32) + e2
    min_d = jnp.min(dist, axis=1, keepdims=True)
    col = jax.lax.broadcasted_iota(jnp.int32, dist.shape, 1)
    ids = jnp.min(jnp.where(dist <= min_d, col, N_EMBED), axis=1, keepdims=True)
    onehot = (col == ids).astype(jnp.float32)                     # [N, K]
    q = jax.lax.dot_general(onehot, e, (((1,), (1,)), ((), ())),
                            preferred_element_type=jnp.float32)   # [N, H]
    ids_ref[...] = ids
    # codebook_loss == commit_loss numerically -> diff = (1 + beta) * mse
    sq = (q - xq) ** 2
    mse = jnp.sum(jnp.sum(sq, axis=1, keepdims=True), axis=0, keepdims=True) \
        / float(sq.shape[0] * sq.shape[1])
    diff_ref[...] = (1.0 + BETA) * mse

    # ---- quantize_output: Conv1d(n_patch -> seq_len, kernel=1) as a single
    #      matmul against the block-diagonal (per-batch) upsample weight ----
    up = jnp.dot(upw_ref[...], q, preferred_element_type=jnp.float32) + upb_ref[...]

    # ---- Decoder: TCN + lane-dense output projection (padded to 128 lanes) ----
    hdec = _tcn(up, 1, tw_ref, tb_ref, g_ref, be_ref, a_ref, ow_ref, ob_ref, rib)
    dec_ref[...] = jnp.dot(hdec, dow_ref[...],
                           preferred_element_type=jnp.float32) + dob_ref[...]


# ====================== pallas_call wrapper ======================

def _vspec():
    return pl.BlockSpec(memory_space=_VMEM)


@jax.jit
def _forward_jit(params, x):
    b, l, f = x.shape
    h = HIDDEN_DIM
    et, dt = params['enc_tcn'], params['dec_tcn']
    stack = lambda k: jnp.stack([et[k], dt[k]])
    # Stack enc/dec TCN params into single operands; fold the K taps of each
    # conv into one [K*H, H] matrix (fewer, deeper MXU dots).
    tcn_w = jnp.stack([et['w'].reshape(N_CONV, KERNEL_SIZE * h, h),
                       dt['w'].reshape(N_CONV, KERNEL_SIZE * h, h)])
    tcn_b, tcn_g, tcn_be = stack('b'), stack('g'), stack('be')
    tcn_a = jnp.stack([et['a'], dt['a']])                          # [2, N_BLOCKS]
    tcn_ow, tcn_ob = stack('ow'), stack('ob')
    # Block-diagonal Conv1d(kernel=1) upsample weight over the stacked batch rows.
    upw = jnp.kron(jnp.eye(b, dtype=jnp.float32), params['qout_w'])   # [B*L, B*NP]
    upb = jnp.tile(params['qout_b'], (b, 1))                          # [B*L, 1]
    # Zero-pad the decoder head so the kernel's final store is lane-dense.
    dow = jnp.zeros((h, DEC_PAD), jnp.float32).at[:, :f].set(params['dec_out_w'])
    dob = jnp.zeros((1, DEC_PAD), jnp.float32).at[:, :f].set(params['dec_out_b'])

    # TODO(synk): on v7x, split the stacked rows at the batch boundary into a
    # "parallel" grid axis (2 TensorCores) and sum the per-block diff in the wrapper.
    dec_pad, ids, diff = pl.pallas_call(
        _fused_kernel,
        out_shape=(
            jax.ShapeDtypeStruct((b * l, DEC_PAD), jnp.float32),
            jax.ShapeDtypeStruct((b * N_PATCH, 1), jnp.int32),
            jax.ShapeDtypeStruct((1, 1), jnp.float32),
        ),
        in_specs=[_vspec()] * 7
                 + [pl.BlockSpec(memory_space=_SMEM)]
                 + [_vspec()] * 9,
        out_specs=(_vspec(), _vspec(), _vspec()),
        scratch_shapes=[pltpu.VMEM((b * l, h), jnp.float32)],
    )(x.reshape(b * l, f), params['enc_in_w'], params['enc_in_b'],
      tcn_w, tcn_b, tcn_g, tcn_be, tcn_a, tcn_ow, tcn_ob,
      params['qin_w'], params['qin_b'], params['embed'], upw, upb, dow, dob)

    dec = dec_pad[:, :f].reshape(b, l, f)
    return dec, diff[0, 0], ids.reshape(b, N_PATCH)


def tstokenizer_forward(params, x):
    _roll_sign()   # eager, cached; must be resolved outside the jit trace
    return _forward_jit(params, x)


# ====================== deterministic parameter init ======================

def _xavier(key, shape):
    std = (2.0 / (shape[0] + shape[1])) ** 0.5
    return std * jax.random.normal(key, shape, jnp.float32)


def _init_tcn(key, d):
    kw, kb, ko = jax.random.split(key, 3)
    return dict(
        w=0.1 * jax.random.normal(kw, (N_CONV, KERNEL_SIZE, d, d), jnp.float32),
        b=0.1 * jax.random.normal(kb, (N_CONV, 1, d), jnp.float32),
        g=jnp.ones((N_CONV, 1, d), jnp.float32),
        be=jnp.zeros((N_CONV, 1, d), jnp.float32),
        # PyTorch inits the residual scale `a` to 1e-8; 0.25 here so the conv
        # path contributes measurably and the self-check exercises it.
        a=jnp.full((N_BLOCKS,), 0.25, jnp.float32),
        ow=_xavier(ko, (d, d)),
        ob=jnp.full((1, d), 0.1, jnp.float32),
    )


def init_params(key):
    ks = jax.random.split(key, 10)
    h = HIDDEN_DIM
    return dict(
        enc_in_w=_xavier(ks[0], (FEAT_DIM, h)),
        enc_in_b=jnp.full((1, h), 0.1, jnp.float32),
        enc_tcn=_init_tcn(ks[1], h),
        qin_w=_xavier(ks[2], (WAVE_LENGTH * h, h)),
        qin_b=jnp.full((1, h), 0.1, jnp.float32),
        embed=jax.random.normal(ks[3], (h, N_EMBED), jnp.float32),
        qout_w=0.1 * jax.random.normal(ks[4], (SEQ_LEN, N_PATCH), jnp.float32),
        qout_b=0.1 * jax.random.normal(ks[5], (SEQ_LEN, 1), jnp.float32),
        dec_tcn=_init_tcn(ks[6], h),
        dec_out_w=_xavier(ks[7], (h, FEAT_DIM)),
        dec_out_b=jnp.full((1, FEAT_DIM), 0.1, jnp.float32),
    )


# ====================== pure-JAX reference (correctness check) ======================

def reference_forward(params, x):
    b, l, _ = x.shape
    h_dim = HIDDEN_DIM

    def causal_conv(h, w_taps, bias, dil):
        pad = (KERNEL_SIZE - 1) * dil
        hp = jnp.pad(h, ((0, 0), (pad, 0), (0, 0)))
        acc = bias
        for t in range(KERNEL_SIZE):
            acc = acc + hp[:, t * dil: t * dil + l, :] @ w_taps[t]
        return acc

    def ln_relu(y, g, be):
        mu = y.mean(-1, keepdims=True)
        var = ((y - mu) ** 2).mean(-1, keepdims=True)
        return jax.nn.relu((y - mu) / jnp.sqrt(var + LN_EPS) * g + be)

    def tcn(hh, p):
        for blk, dil in enumerate(TCN_DILATIONS):
            c1, c2 = 2 * blk, 2 * blk + 1
            o1 = ln_relu(causal_conv(hh, p['w'][c1], p['b'][c1], dil),
                         p['g'][c1], p['be'][c1])
            o2 = ln_relu(causal_conv(o1, p['w'][c2], p['b'][c2], 2 * dil),
                         p['g'][c2], p['be'][c2])
            hh = p['a'][blk] * o2 + hh
        return hh @ p['ow'] + p['ob']

    enc = x @ params['enc_in_w'] + params['enc_in_b']
    enc = tcn(enc, params['enc_tcn'])
    patches = enc.reshape(b, N_PATCH, WAVE_LENGTH * h_dim)
    quant = patches @ params['qin_w'] + params['qin_b']
    flat = quant.reshape(b * N_PATCH, h_dim)
    e = params['embed']
    dist = (flat ** 2).sum(1, keepdims=True) - 2 * flat @ e \
        + (e ** 2).sum(0, keepdims=True)
    ids = jnp.argmin(dist, axis=1)
    q = e.T[ids]
    diff = (1.0 + BETA) * jnp.mean((q - flat) ** 2)
    qb = q.reshape(b, N_PATCH, h_dim)
    up = jnp.einsum('lp,bph->blh', params['qout_w'], qb) + params['qout_b'][None]
    dec = tcn(up, params['dec_tcn'])
    dec = dec @ params['dec_out_w'] + params['dec_out_b']
    return dec, diff, ids.reshape(b, N_PATCH).astype(jnp.int32)


# ====================== main ======================

if __name__ == "__main__":
    key = jax.random.PRNGKey(0)
    k_x, k_p = jax.random.split(key)
    params = init_params(k_p)
    x = jax.random.normal(k_x, (BATCH, SEQ_LEN, FEAT_DIM), jnp.float32)

    dec, diff, ids = tstokenizer_forward(params, x)
    jax.block_until_ready((dec, diff, ids))

    assert dec.shape == (BATCH, SEQ_LEN, FEAT_DIM)
    assert diff.shape == ()
    assert ids.shape == (BATCH, N_PATCH) and ids.dtype == jnp.int32

    # Validate the fused kernel against a pure-JAX reference on the same params.
    dec_r, diff_r, ids_r = reference_forward(params, x)
    np.testing.assert_allclose(np.asarray(dec), np.asarray(dec_r),
                               rtol=5e-3, atol=5e-3)
    np.testing.assert_allclose(float(diff), float(diff_r), rtol=5e-3, atol=5e-3)
    assert np.array_equal(np.asarray(ids), np.asarray(ids_r))

    # TODO(synk): EMA codebook update (training-only buffer mutation), Dropout
    # (eval=identity) and the optional padding-mask path are not modeled.
    print("KERNEL_OK")
</pallas_src>

<mosaic_0001>
module attributes {stable_mosaic.version = 11 : i64} {
  func.func @_roll_probe_kernel(%arg0: memref<8x128xf32, #tpu.memory_space<vmem>>, %arg1: memref<8x128xf32, #tpu.memory_space<vmem>>) attributes {dimension_semantics = [], scalar_prefetch = 0 : i64, scratch_operands = 0 : i64, tpu.core_type = #tpu.core_type<tc>} {
    %c0 = arith.constant 0 : index
    %c0_0 = arith.constant 0 : index
    %0 = vector.load %arg0[%c0, %c0_0] : memref<8x128xf32, #tpu.memory_space<vmem>>, vector<8x128xf32>
    %c1_i32 = arith.constant 1 : i32
    %1 = tpu.dynamic_rotate %0 by %c1_i32 dim 0 : vector<8x128xf32>, i32 -> vector<8x128xf32>
    %c0_1 = arith.constant 0 : index
    %c0_2 = arith.constant 0 : index
    %2 = vector.load %arg1[%c0_1, %c0_2] : memref<8x128xf32, #tpu.memory_space<vmem>>, vector<8x128xf32>
    tpu.vector_store %arg1[%c0_1, %c0_2], %1 {strides = array<i32>} : memref<8x128xf32, #tpu.memory_space<vmem>>, vector<8x128xf32>,
    return
  }
}

</mosaic_0001>

<bundles_post_ra>
// kernel: tpu_custom_call.1
= control target key start
LH: loop header
LB: loop body
LE: loop exit
PB: predicated region body
PF: predicated region fallthrough
CT: control target
= control target key end

     0   :  { %6 = vsyncpa [#allocation3], 0  ;;  %s115_s0 = inlined_call_operand.hbm [shape: f32[8,128], index: 0, kind: input, shape index: {}]   ;;  %s116_s1 = inlined_call_operand.hbm [shape: f32[8,128], index: 1, kind: output, shape index: {}]  }
   0x1   :  { %7 = vsyncpa [#allocation4], 0  ;;  %s13_s8 = sshll.u32 %s115_s0, 4  ;;  %s97_s9 = smov [#allocation2]   ;;  %s14_s8 = int_to_ptr.hbm [resolvable:$true] %s13_s8 }
   0x2   :  { %s15_s10 = sshll.u32 %s97_s9, 4  ;;  %s16_s10 = int_to_ptr.vmem [resolvable:$true] %s15_s10 }
   0x3   :  { %18 = dma.hbm_to_vmem [thread:$0]  %s14_s8, 128, %s16_s10, [#allocation3]  }
   0x4   :  { %93 = dma.done.wait [#allocation3], 128  }
   0x5   :  { %94 = vsyncadd [#allocation3], 4294967168  ;;  %s98_s11 = smov [#allocation5]   ;;  %s33_s15 = sshll.u32 %s116_s1, 4  ;;  %v23_v0 = vld [vmem:[#allocation2] sm:$0xff]  ;;  %s34_s15 = int_to_ptr.hbm [resolvable:$true] %s33_s15 }
   0x6   :  { %s31_s12 = sshll.u32 %s98_s11, 4  ;;  %v24_v1 = vrot.slane %v23_v0, 7  ;;  %s32_s12 = int_to_ptr.vmem [resolvable:$true] %s31_s12 }
   0x8   :  { %25 = vst [vmem:[#allocation5] sm:$0xff] %v24_v1 }
   0x9   :  { %36 = dma.vmem_to_hbm [thread:$0]  %s32_s12, 128, %s34_s15, [#allocation4]  }
   0xa   :  { %95 = dma.done.wait [#allocation4], 128  }
   0xb   :  { %96 = vsyncadd [#allocation4], 4294967168 }
   0xc   :  { %41 = vsyncpa [#allocation3], 1 }
   0xd   :  { %42 = vsyncpa [#allocation4], 1 }

</bundles_post_ra>
